<compile_context>
chip_gen: v7x
topology: tpu7x:2x2x1
jax: 0.10.0
libtpu: 0.0.40
codegen_flags: <defaults>
</compile_context>

<pallas_src>
import jax
import jax.numpy as jnp
from jax.experimental import pallas as pl
from jax.experimental.pallas import tpu as pltpu


def _round_up(x, m):
    return ((x + m - 1) // m) * m


def _vmem_capacity_bytes():
    try:
        info = pltpu.get_tpu_info()
        cap = getattr(info, "vmem_capacity_bytes", None)
        if cap:
            return int(cap)
    except Exception:
        pass
    return 64 << 20  # conservative default (v7x-sized) if the query fails


def _text_model_kernel(x_ref, len_ref, w_ref, b_ref, o_ref, acc_ref):
    # x_ref:   [TB, TS, H] bf16/f32    len_ref: [TB, 1] i32
    # w_ref:   [H, D]                  b_ref:   [1, D]
    # o_ref:   [TB, D] f32             acc_ref: [TB, H] f32 (VMEM scratch)
    si = pl.program_id(1)
    n_si = pl.num_programs(1)
    TS = x_ref.shape[1]

    @pl.when(si == 0)
    def _():
        acc_ref[...] = jnp.zeros_like(acc_ref)

    lens = len_ref[...]                                            # [TB, 1] i32
    x = x_ref[...]                                                 # [TB, TS, H]
    # Token-validity mask built directly in the tile's [S-sublane, H-lane]
    # layout (pure VPU compare, no relayout).  jnp.where (not a multiply) is
    # NaN-safe: stale data in unpadded S / B tails cannot poison valid rows.
    tok = jax.lax.broadcasted_iota(jnp.int32, x.shape, 1) + si * TS
    valid = tok < lens[:, :, None]
    xm = jnp.where(valid, x, jnp.zeros((), x.dtype))
    # Masked sum over this sequence tile (pool BEFORE projecting), f32 acc.
    acc_ref[...] += jnp.sum(xm.astype(jnp.float32), axis=1)        # [TB, H]

    @pl.when(si == n_si - 1)
    def _():
        count = jnp.maximum(lens.astype(jnp.float32), 1.0)         # [TB, 1]
        # mean_s(x_s @ W + b) == (sum_s x_s) @ W / count + b   (affine)
        proj = jnp.dot(acc_ref[...], w_ref[...].astype(jnp.float32),
                       preferred_element_type=jnp.float32)         # [TB, D]
        pooled = proj * (1.0 / count) + b_ref[...].astype(jnp.float32)
        # F.normalize(p=2, dim=-1): x / max(||x||_2, 1e-12)
        sq = jnp.sum(pooled * pooled, axis=-1, keepdims=True)      # [TB, 1]
        inv_norm = jax.lax.rsqrt(jnp.maximum(sq, 1e-24))           # EUP rsqrt
        o_ref[...] = (pooled * inv_norm).astype(o_ref.dtype)


def text_model_forward(texts, lengths, weight, bias, *,
                       tb=None, ts=None, activation_dtype=jnp.bfloat16,
                       vmem_limit_bytes=None):
    B, S, H = texts.shape
    D = weight.shape[-1]

    # Stream activations as bf16 (no-op if the backbone already hands us bf16).
    if activation_dtype is not None and texts.dtype != activation_dtype:
        texts = texts.astype(activation_dtype)
    x = texts
    ln = jnp.asarray(lengths, dtype=jnp.int32).reshape(B, 1)
    w = jnp.asarray(weight)
    b = jnp.asarray(bias).reshape(1, D)

    # Per-generation budgets (v5e/v6e: 128 MiB VMEM; v7x: 64 MiB).
    vmem_cap = _vmem_capacity_bytes()
    big_vmem = vmem_cap >= (100 << 20)
    texts_budget = (16 << 20) if big_vmem else (8 << 20)   # double-buffered texts
    vmem_cap_limit = (100 << 20) if big_vmem else (52 << 20)

    if tb is None:
        tb = min(_round_up(B, 8), 256 if big_vmem else 128)
    tb = max(8, _round_up(tb, 8))

    x_itemsize = jnp.dtype(x.dtype).itemsize
    if ts is None:
        # Biggest TS (mult of 8) whose double-buffered texts tile fits budget.
        ts = _round_up(S, 8)
        while ts > 8 and 2 * tb * ts * H * x_itemsize > texts_budget:
            ts = _round_up(ts // 2, 8)
    ts = max(8, _round_up(ts, 8))

    grid = (pl.cdiv(B, tb), pl.cdiv(S, ts))

    if vmem_limit_bytes is None:
        tile_x = tb * ts * H * x_itemsize
        est = (2 * tile_x                       # double-buffered texts stream
               + 4 * tile_x                     # iota / mask / select / f32 temps
               + 2 * H * D * jnp.dtype(w.dtype).itemsize   # weight
               + 2 * D * jnp.dtype(b.dtype).itemsize       # bias
               + 2 * tb * 4                     # lengths
               + 2 * tb * D * 4                 # output tile
               + tb * H * 4                     # accumulator scratch
               + 4 * tb * D * 4)                # finalize temporaries
        vmem_limit_bytes = int(min(max(est + (4 << 20), 16 << 20), vmem_cap_limit))

    def _build(single_buffer_consts):
        const_kw = ({"pipeline_mode": pl.Buffered(buffer_count=1)}
                    if single_buffer_consts else {})
        grid_spec = pltpu.PrefetchScalarGridSpec(
            num_scalar_prefetch=0,
            grid=grid,
            in_specs=[
                pl.BlockSpec((tb, ts, H), lambda bi, si: (bi, si, 0)),
                pl.BlockSpec((tb, 1), lambda bi, si: (bi, 0)),
                pl.BlockSpec((H, D), lambda bi, si: (0, 0), **const_kw),
                pl.BlockSpec((1, D), lambda bi, si: (0, 0), **const_kw),
            ],
            out_specs=pl.BlockSpec((tb, D), lambda bi, si: (bi, 0)),
            scratch_shapes=[pltpu.VMEM((tb, H), jnp.float32)],
        )
        return pl.pallas_call(
            _text_model_kernel,
            out_shape=jax.ShapeDtypeStruct((B, D), jnp.float32),
            grid_spec=grid_spec,
            compiler_params=pltpu.CompilerParams(
                dimension_semantics=("parallel", "arbitrary"),
                vmem_limit_bytes=vmem_limit_bytes),
        )

    try:
        # Weight/bias are grid-invariant: single-buffer them and give the VMEM
        # back to the texts tile (matters most on v7x's 64 MiB VMEM).
        return _build(True)(x, ln, w, b)
    except Exception:
        # Installed JAX rejects Buffered(1) on pallas_call specs -> default 2.
        return _build(False)(x, ln, w, b)


def _reference(texts, lengths, weight, bias):
    # Original formulation: project every token, masked mean, F.normalize.
    B, S, H = texts.shape
    texts = texts.astype(jnp.float32)
    mask = (jnp.arange(S, dtype=jnp.int32)[None, :]
            < lengths[:, None]).astype(jnp.float32)
    proj = jnp.einsum("bsh,hd->bsd", texts,
                      weight.astype(jnp.float32)) + bias.reshape(1, 1, -1)
    m = mask[:, :, None]
    pooled = jnp.sum(proj * m, axis=1) / jnp.maximum(jnp.sum(m, axis=1), 1.0)
    norm = jnp.sqrt(jnp.sum(pooled * pooled, axis=-1, keepdims=True))
    return pooled / jnp.maximum(norm, 1e-12)


if __name__ == "__main__":
    B, S, H, D = 2, 16, 32, 32

    key = jax.random.PRNGKey(0)
    k_txt, k_w = jax.random.split(key)

    texts_f32 = jax.random.normal(k_txt, (B, S, H), dtype=jnp.float32)
    # maskTexts as in the PyTorch forward: batch 0 has 16 valid tokens,
    # batch 1 has 9 (crosses the sequence-tile boundary when ts=8).
    maskTexts = jnp.array([[1.0] * 16, [1.0] * 9 + [0.0] * 7], jnp.float32)
    lengths = maskTexts.sum(-1).astype(jnp.int32)

    weight = jax.random.normal(k_w, (H, D), dtype=jnp.float32) * 0.02
    bias = jnp.zeros((1, D), dtype=jnp.float32)

    # Backbone activations streamed as bf16; kernel accumulates in f32.
    texts = texts_f32.astype(jnp.bfloat16)

    # ts=8 forces two reduction steps so the accumulator init/finalize path
    # and the cross-tile length mask are exercised at these toy shapes.
    out = text_model_forward(texts, lengths, weight, bias, ts=8)
    out = jax.block_until_ready(out)

    ref = _reference(texts, lengths, weight, bias)
    assert out.shape == (B, D)
    assert jnp.allclose(out, ref, atol=1e-2, rtol=1e-2), "mismatch vs reference"
    # Output rows are unit-norm, as F.normalize guarantees.
    assert jnp.allclose(jnp.linalg.norm(out, axis=-1), 1.0, atol=2e-3)

    print("KERNEL_OK")
</pallas_src>

<mosaic_0001>
module attributes {stable_mosaic.version = 11 : i64} {
  func.func @_text_model_kernel(%arg0: i32, %arg1: i32, %arg2: memref<8x8x32xbf16, #tpu.memory_space<vmem>>, %arg3: memref<8x1xi32, #tpu.memory_space<vmem>>, %arg4: memref<32x32xf32, #tpu.memory_space<vmem>>, %arg5: memref<1x32xf32, #tpu.memory_space<vmem>>, %arg6: memref<8x32xf32, #tpu.memory_space<vmem>>, %arg7: memref<8x32xf32, #tpu.memory_space<vmem>>) attributes {dimension_semantics = [#tpu.dimension_semantics<parallel>, #tpu.dimension_semantics<arbitrary>], iteration_bounds = array<i64: 1, 2>, scalar_prefetch = 0 : i64, scratch_operands = 1 : i64, tpu.core_type = #tpu.core_type<tc>, window_params = [{transform_indices = @transform_0, window_bounds = array<i64: 8, 8, 32>}, {transform_indices = @transform_1, window_bounds = array<i64: 8, 1>}, {pipeline_mode = #tpu.pipeline_mode<synchronous>, transform_indices = @transform_2, window_bounds = array<i64: 32, 32>}, {pipeline_mode = #tpu.pipeline_mode<synchronous>, transform_indices = @transform_3, window_bounds = array<i64: 1, 32>}, {transform_indices = @transform_4, window_bounds = array<i64: 8, 32>}]} {
    %c0_i32 = arith.constant 0 : i32
    %0 = arith.cmpi eq, %arg1, %c0_i32 : i32
    %1 = arith.extui %0 : i1 to i32
    %c0_i32_0 = arith.constant 0 : i32
    %2 = arith.cmpi ne, %1, %c0_i32_0 : i32
    scf.if %2 {
      %cst_11 = arith.constant 0.000000e+00 : f32
      %22 = vector.broadcast %cst_11 : f32 to vector<8x32xf32>
      %c0_12 = arith.constant 0 : index
      %c0_13 = arith.constant 0 : index
      %23 = vector.load %arg7[%c0_12, %c0_13] : memref<8x32xf32, #tpu.memory_space<vmem>>, vector<8x32xf32>
      tpu.vector_store %arg7[%c0_12, %c0_13], %22 {strides = array<i32>} : memref<8x32xf32, #tpu.memory_space<vmem>>, vector<8x32xf32>,
    } else {
    }
    %c0 = arith.constant 0 : index
    %c0_1 = arith.constant 0 : index
    %3 = vector.load %arg3[%c0, %c0_1] : memref<8x1xi32, #tpu.memory_space<vmem>>, vector<8x1xi32>
    %c0_2 = arith.constant 0 : index
    %c0_3 = arith.constant 0 : index
    %c0_4 = arith.constant 0 : index
    %4 = vector.load %arg2[%c0_2, %c0_3, %c0_4] : memref<8x8x32xbf16, #tpu.memory_space<vmem>>, vector<8x8x32xbf16>
    %5 = tpu.iota {dimensions = array<i32: 1>} : vector<8x8x32xi32>
    %c8_i32 = arith.constant 8 : i32
    %6 = arith.muli %arg1, %c8_i32 : i32
    %7 = vector.broadcast %6 : i32 to vector<8x8x32xi32>
    %8 = arith.addi %5, %7 : vector<8x8x32xi32>
    %9 = vector.shape_cast %3 : vector<8x1xi32> to vector<8x1x1xi32>
    %10 = vector.broadcast %9 : vector<8x1x1xi32> to vector<8x8x32xi32>
    %11 = arith.cmpi slt, %8, %10 : vector<8x8x32xi32>
    %cst = arith.constant 0.000000e+00 : bf16
    %12 = vector.broadcast %cst : bf16 to vector<8x8x32xbf16>
    %13 = arith.select %11, %4, %12 : vector<8x8x32xi1>, vector<8x8x32xbf16>
    %c0_5 = arith.constant 0 : index
    %c0_6 = arith.constant 0 : index
    %14 = vector.load %arg7[%c0_5, %c0_6] : memref<8x32xf32, #tpu.memory_space<vmem>>, vector<8x32xf32>
    %15 = arith.extf %13 : vector<8x8x32xbf16> to vector<8x8x32xf32>
    %cst_7 = arith.constant dense<0.000000e+00> : vector<8x32xf32>
    %16 = vector.multi_reduction <add>, %15, %cst_7 [1] : vector<8x8x32xf32> to vector<8x32xf32>
    %17 = arith.addf %14, %16 : vector<8x32xf32>
    %c0_8 = arith.constant 0 : index
    %c0_9 = arith.constant 0 : index
    %18 = vector.load %arg7[%c0_8, %c0_9] : memref<8x32xf32, #tpu.memory_space<vmem>>, vector<8x32xf32>
    tpu.vector_store %arg7[%c0_8, %c0_9], %17 {strides = array<i32>} : memref<8x32xf32, #tpu.memory_space<vmem>>, vector<8x32xf32>,
    %c1_i32 = arith.constant 1 : i32
    %19 = arith.cmpi eq, %arg1, %c1_i32 : i32
    %20 = arith.extui %19 : i1 to i32
    %c0_i32_10 = arith.constant 0 : i32
    %21 = arith.cmpi ne, %20, %c0_i32_10 : i32
    scf.if %21 {
      %22 = arith.sitofp %3 : vector<8x1xi32> to vector<8x1xf32>
      %cst_11 = arith.constant 1.000000e+00 : f32
      %23 = vector.broadcast %cst_11 : f32 to vector<8x1xf32>
      %24 = arith.maximumf %22, %23 : vector<8x1xf32>
      %c0_12 = arith.constant 0 : index
      %c0_13 = arith.constant 0 : index
      %25 = vector.load %arg7[%c0_12, %c0_13] : memref<8x32xf32, #tpu.memory_space<vmem>>, vector<8x32xf32>
      %c0_14 = arith.constant 0 : index
      %c0_15 = arith.constant 0 : index
      %26 = vector.load %arg4[%c0_14, %c0_15] : memref<32x32xf32, #tpu.memory_space<vmem>>, vector<32x32xf32>
      %cst_16 = arith.constant dense<0.000000e+00> : vector<8x32xf32>
      %27 = tpu.matmul %25, %26, %cst_16 {dimension_numbers = #tpu.dot_dimension_numbers<[1], [0], [0], [1], [0, 0, 1, 1], [], []>} : vector<8x32xf32>, vector<32x32xf32>, vector<8x32xf32> -> vector<8x32xf32>
      %cst_17 = arith.constant 1.000000e+00 : f32
      %28 = vector.broadcast %cst_17 : f32 to vector<8x1xf32>
      %29 = arith.divf %28, %24 : vector<8x1xf32>
      %30 = vector.broadcast %29 : vector<8x1xf32> to vector<8x32xf32>
      %31 = arith.mulf %27, %30 : vector<8x32xf32>
      %c0_18 = arith.constant 0 : index
      %c0_19 = arith.constant 0 : index
      %32 = vector.load %arg5[%c0_18, %c0_19] : memref<1x32xf32, #tpu.memory_space<vmem>>, vector<1x32xf32>
      %33 = vector.broadcast %32 : vector<1x32xf32> to vector<8x32xf32>
      %34 = arith.addf %31, %33 : vector<8x32xf32>
      %35 = arith.mulf %34, %34 : vector<8x32xf32>
      %cst_20 = arith.constant dense<0.000000e+00> : vector<8xf32>
      %36 = vector.multi_reduction <add>, %35, %cst_20 [1] : vector<8x32xf32> to vector<8xf32>
      %37 = vector.shape_cast %36 : vector<8xf32> to vector<8x1xf32>
      %cst_21 = arith.constant 1.000000e-24 : f32
      %38 = vector.broadcast %cst_21 : f32 to vector<8x1xf32>
      %39 = arith.maximumf %37, %38 : vector<8x1xf32>
      %40 = math.rsqrt %39 : vector<8x1xf32>
      %41 = vector.broadcast %40 : vector<8x1xf32> to vector<8x32xf32>
      %42 = arith.mulf %34, %41 : vector<8x32xf32>
      %c0_22 = arith.constant 0 : index
      %c0_23 = arith.constant 0 : index
      %43 = vector.load %arg6[%c0_22, %c0_23] : memref<8x32xf32, #tpu.memory_space<vmem>>, vector<8x32xf32>
      tpu.vector_store %arg6[%c0_22, %c0_23], %42 {strides = array<i32>} : memref<8x32xf32, #tpu.memory_space<vmem>>, vector<8x32xf32>,
    } else {
    }
    return
  }
  func.func @transform_0(%arg0: i32, %arg1: i32) -> (i32, i32, i32) {
    %c0_i32 = arith.constant 0 : i32
    %c0_i32_0 = arith.constant 0 : i32
    return %arg0, %arg1, %c0_i32 : i32, i32, i32
  }
  func.func @transform_1(%arg0: i32, %arg1: i32) -> (i32, i32) {
    %c0_i32 = arith.constant 0 : i32
    %c0_i32_0 = arith.constant 0 : i32
    return %arg0, %c0_i32 : i32, i32
  }
  func.func @transform_2(%arg0: i32, %arg1: i32) -> (i32, i32) {
    %c0_i32 = arith.constant 0 : i32
    %c0_i32_0 = arith.constant 0 : i32
    %c0_i32_1 = arith.constant 0 : i32
    return %c0_i32, %c0_i32_0 : i32, i32
  }
  func.func @transform_3(%arg0: i32, %arg1: i32) -> (i32, i32) {
    %c0_i32 = arith.constant 0 : i32
    %c0_i32_0 = arith.constant 0 : i32
    %c0_i32_1 = arith.constant 0 : i32
    return %c0_i32, %c0_i32_0 : i32, i32
  }
  func.func @transform_4(%arg0: i32, %arg1: i32) -> (i32, i32) {
    %c0_i32 = arith.constant 0 : i32
    %c0_i32_0 = arith.constant 0 : i32
    return %arg0, %c0_i32 : i32, i32
  }
}

module attributes {stable_mosaic.version = 11 : i64} {
  func.func @_text_model_kernel(%arg0: i32, %arg1: i32, %arg2: memref<8x8x32xbf16, #tpu.memory_space<vmem>>, %arg3: memref<8x1xi32, #tpu.memory_space<vmem>>, %arg4: memref<32x32xf32, #tpu.memory_space<vmem>>, %arg5: memref<1x32xf32, #tpu.memory_space<vmem>>, %arg6: memref<8x32xf32, #tpu.memory_space<vmem>>, %arg7: memref<8x32xf32, #tpu.memory_space<vmem>>) attributes {dimension_semantics = [#tpu.dimension_semantics<parallel>, #tpu.dimension_semantics<arbitrary>], iteration_bounds = array<i64: 1, 2>, scalar_prefetch = 0 : i64, scratch_operands = 1 : i64, tpu.core_type = #tpu.core_type<tc>, window_params = [{transform_indices = @transform_0, window_bounds = array<i64: 8, 8, 32>}, {transform_indices = @transform_1, window_bounds = array<i64: 8, 1>}, {pipeline_mode = #tpu.pipeline_mode<synchronous>, transform_indices = @transform_2, window_bounds = array<i64: 32, 32>}, {pipeline_mode = #tpu.pipeline_mode<synchronous>, transform_indices = @transform_3, window_bounds = array<i64: 1, 32>}, {transform_indices = @transform_4, window_bounds = array<i64: 8, 32>}]} {
    %c0_i32 = arith.constant 0 : i32
    %0 = arith.cmpi eq, %arg1, %c0_i32 : i32
    %1 = arith.extui %0 : i1 to i32
    %c0_i32_0 = arith.constant 0 : i32
    %2 = arith.cmpi ne, %1, %c0_i32_0 : i32
    scf.if %2 {
      %cst_11 = arith.constant 0.000000e+00 : f32
      %22 = vector.broadcast %cst_11 : f32 to vector<8x32xf32>
      %c0_12 = arith.constant 0 : index
      %c0_13 = arith.constant 0 : index
      %23 = vector.load %arg7[%c0_12, %c0_13] : memref<8x32xf32, #tpu.memory_space<vmem>>, vector<8x32xf32>
      tpu.vector_store %arg7[%c0_12, %c0_13], %22 {strides = array<i32>} : memref<8x32xf32, #tpu.memory_space<vmem>>, vector<8x32xf32>,
    } else {
    }
    %c0 = arith.constant 0 : index
    %c0_1 = arith.constant 0 : index
    %3 = vector.load %arg3[%c0, %c0_1] : memref<8x1xi32, #tpu.memory_space<vmem>>, vector<8x1xi32>
    %c0_2 = arith.constant 0 : index
    %c0_3 = arith.constant 0 : index
    %c0_4 = arith.constant 0 : index
    %4 = vector.load %arg2[%c0_2, %c0_3, %c0_4] : memref<8x8x32xbf16, #tpu.memory_space<vmem>>, vector<8x8x32xbf16>
    %5 = tpu.iota {dimensions = array<i32: 1>} : vector<8x8x32xi32>
    %c8_i32 = arith.constant 8 : i32
    %6 = arith.muli %arg1, %c8_i32 : i32
    %7 = vector.broadcast %6 : i32 to vector<8x8x32xi32>
    %8 = arith.addi %5, %7 : vector<8x8x32xi32>
    %9 = vector.shape_cast %3 : vector<8x1xi32> to vector<8x1x1xi32>
    %10 = vector.broadcast %9 : vector<8x1x1xi32> to vector<8x8x32xi32>
    %11 = arith.cmpi slt, %8, %10 : vector<8x8x32xi32>
    %cst = arith.constant 0.000000e+00 : bf16
    %12 = vector.broadcast %cst : bf16 to vector<8x8x32xbf16>
    %13 = arith.select %11, %4, %12 : vector<8x8x32xi1>, vector<8x8x32xbf16>
    %c0_5 = arith.constant 0 : index
    %c0_6 = arith.constant 0 : index
    %14 = vector.load %arg7[%c0_5, %c0_6] : memref<8x32xf32, #tpu.memory_space<vmem>>, vector<8x32xf32>
    %15 = arith.extf %13 : vector<8x8x32xbf16> to vector<8x8x32xf32>
    %cst_7 = arith.constant dense<0.000000e+00> : vector<8x32xf32>
    %16 = vector.multi_reduction <add>, %15, %cst_7 [1] : vector<8x8x32xf32> to vector<8x32xf32>
    %17 = arith.addf %14, %16 : vector<8x32xf32>
    %c0_8 = arith.constant 0 : index
    %c0_9 = arith.constant 0 : index
    %18 = vector.load %arg7[%c0_8, %c0_9] : memref<8x32xf32, #tpu.memory_space<vmem>>, vector<8x32xf32>
    tpu.vector_store %arg7[%c0_8, %c0_9], %17 {strides = array<i32>} : memref<8x32xf32, #tpu.memory_space<vmem>>, vector<8x32xf32>,
    %c1_i32 = arith.constant 1 : i32
    %19 = arith.cmpi eq, %arg1, %c1_i32 : i32
    %20 = arith.extui %19 : i1 to i32
    %c0_i32_10 = arith.constant 0 : i32
    %21 = arith.cmpi ne, %20, %c0_i32_10 : i32
    scf.if %21 {
      %22 = arith.sitofp %3 : vector<8x1xi32> to vector<8x1xf32>
      %cst_11 = arith.constant 1.000000e+00 : f32
      %23 = vector.broadcast %cst_11 : f32 to vector<8x1xf32>
      %24 = arith.maximumf %22, %23 : vector<8x1xf32>
      %c0_12 = arith.constant 0 : index
      %c0_13 = arith.constant 0 : index
      %25 = vector.load %arg7[%c0_12, %c0_13] : memref<8x32xf32, #tpu.memory_space<vmem>>, vector<8x32xf32>
      %c0_14 = arith.constant 0 : index
      %c0_15 = arith.constant 0 : index
      %26 = vector.load %arg4[%c0_14, %c0_15] : memref<32x32xf32, #tpu.memory_space<vmem>>, vector<32x32xf32>
      %cst_16 = arith.constant dense<0.000000e+00> : vector<8x32xf32>
      %27 = tpu.matmul %25, %26, %cst_16 {dimension_numbers = #tpu.dot_dimension_numbers<[1], [0], [0], [1], [0, 0, 1, 1], [], []>} : vector<8x32xf32>, vector<32x32xf32>, vector<8x32xf32> -> vector<8x32xf32>
      %cst_17 = arith.constant 1.000000e+00 : f32
      %28 = vector.broadcast %cst_17 : f32 to vector<8x1xf32>
      %29 = arith.divf %28, %24 : vector<8x1xf32>
      %30 = vector.broadcast %29 : vector<8x1xf32> to vector<8x32xf32>
      %31 = arith.mulf %27, %30 : vector<8x32xf32>
      %c0_18 = arith.constant 0 : index
      %c0_19 = arith.constant 0 : index
      %32 = vector.load %arg5[%c0_18, %c0_19] : memref<1x32xf32, #tpu.memory_space<vmem>>, vector<1x32xf32>
      %33 = vector.broadcast %32 : vector<1x32xf32> to vector<8x32xf32>
      %34 = arith.addf %31, %33 : vector<8x32xf32>
      %35 = arith.mulf %34, %34 : vector<8x32xf32>
      %cst_20 = arith.constant dense<0.000000e+00> : vector<8xf32>
      %36 = vector.multi_reduction <add>, %35, %cst_20 [1] : vector<8x32xf32> to vector<8xf32>
      %37 = vector.shape_cast %36 : vector<8xf32> to vector<8x1xf32>
      %cst_21 = arith.constant 1.000000e-24 : f32
      %38 = vector.broadcast %cst_21 : f32 to vector<8x1xf32>
      %39 = arith.maximumf %37, %38 : vector<8x1xf32>
      %40 = math.rsqrt %39 : vector<8x1xf32>
      %41 = vector.broadcast %40 : vector<8x1xf32> to vector<8x32xf32>
      %42 = arith.mulf %34, %41 : vector<8x32xf32>
      %c0_22 = arith.constant 0 : index
      %c0_23 = arith.constant 0 : index
      %43 = vector.load %arg6[%c0_22, %c0_23] : memref<8x32xf32, #tpu.memory_space<vmem>>, vector<8x32xf32>
      tpu.vector_store %arg6[%c0_22, %c0_23], %42 {strides = array<i32>} : memref<8x32xf32, #tpu.memory_space<vmem>>, vector<8x32xf32>,
    } else {
    }
    return
  }
  func.func @transform_0(%arg0: i32, %arg1: i32) -> (i32, i32, i32) {
    %c0_i32 = arith.constant 0 : i32
    %c0_i32_0 = arith.constant 0 : i32
    return %arg0, %arg1, %c0_i32 : i32, i32, i32
  }
  func.func @transform_1(%arg0: i32, %arg1: i32) -> (i32, i32) {
    %c0_i32 = arith.constant 0 : i32
    %c0_i32_0 = arith.constant 0 : i32
    return %arg0, %c0_i32 : i32, i32
  }
  func.func @transform_2(%arg0: i32, %arg1: i32) -> (i32, i32) {
    %c0_i32 = arith.constant 0 : i32
    %c0_i32_0 = arith.constant 0 : i32
    %c0_i32_1 = arith.constant 0 : i32
    return %c0_i32, %c0_i32_0 : i32, i32
  }
  func.func @transform_3(%arg0: i32, %arg1: i32) -> (i32, i32) {
    %c0_i32 = arith.constant 0 : i32
    %c0_i32_0 = arith.constant 0 : i32
    %c0_i32_1 = arith.constant 0 : i32
    return %c0_i32, %c0_i32_0 : i32, i32
  }
  func.func @transform_4(%arg0: i32, %arg1: i32) -> (i32, i32) {
    %c0_i32 = arith.constant 0 : i32
    %c0_i32_0 = arith.constant 0 : i32
    return %arg0, %c0_i32 : i32, i32
  }
}

</mosaic_0001>

<bundles_post_ra>
// kernel: tpu_custom_call.1
= control target key start
LH: loop header
LB: loop body
LE: loop exit
PB: predicated region body
PF: predicated region fallthrough
CT: control target
= control target key end

     0   :  { %9 = vsyncpa [#allocation4], 0  ;;  %s1244_s0 = inlined_call_operand.hbm [shape: bf16[2,16,32], index: 0, kind: input, shape index: {}]   ;;  %s1245_s1 = inlined_call_operand.vmem [shape: s32[2,1], index: 1, kind: input, shape index: {}]   ;;  %s1246_s2 = inlined_call_operand.hbm [shape: f32[32,32], index: 2, kind: input, shape index: {}]   ;;  %s1247_s3 = inlined_call_operand.vmem [shape: f32[1,32], index: 3, kind: input, shape index: {}]   ;;  %s1248_s4 = inlined_call_operand.hbm [shape: f32[2,32], index: 4, kind: output, shape index: {}]  }
   0x1   :  { %11 = vsyncpa [#allocation4 + $0x1], 0 }
   0x2   :  { %12 = vsyncpa [#allocation7], 0 }
   0x3   :  { %13 = vsyncpa [#allocation5], 0  ;;  %s1038_s15 = smov 0   ;;  %s1040_s16 = smov 0  }
   0x4   :  { %s1042_s17 = smov 0   ;;  %s1044_s18 = smov 0  }
   0x5   :  { %s1046_s19 = smov 0   ;;  %s1048_s20 = smov 0  }
   0x6 LB: > { %s1067_s21 = sadd.s32 4294967295, %s994_s20   ;;  %s28_s22 = sadd.s32 1, %s990_s19  ;;  %s994_s20 = sphi %s1048_s20, %s19_s20   ;;  %s990_s19 = sphi %s1046_s19, %s1265_s19   ;;  %s986_s18 = sphi %s1044_s18, %s1264_s18   ;;  %s982_s17 = sphi %s1042_s17, %s1263_s17   ;;  %s978_s16 = sphi %s1040_s16, %s1262_s16   ;;  %s974_s15 = sphi %s1038_s15, %s1261_s15  }
   0x7   : > { %p29_p0 = scmp.ge.s32.totalorder %s28_s22, 2  ;;  %s40_s23 = sadd.s32 1, %s982_s17 }
   0x8   : > { %p47_p1 = scmp.ne.s32.totalorder %s982_s17, %s978_s16  ;;  %p48_p2 = scmp.eq.s32.totalorder %s994_s20, 0 }
   0x9   : > { %s1267_s22 = smov (%p29_p0, %s28_s22), 0  ;;  %p53_p4 = scmp.ne.s32.totalorder %s978_s16, %s974_s15 }
   0xa   : > { %p1076_p3 = por %p48_p2, %p47_p1  ;;  %s36_s25 = ssub.s32 %s990_s19, %s1267_s22 }
   0xb   : > { %p1249_p5 = scmp.eq.s32.totalorder %s1067_s21, 0  ;;  %p38_p6 = scmp.eq.s32.totalorder %s36_s25, 0 }
   0xc   : > { %s1252_s24 = scalar_select %p1076_p3, 1, 0 }
   0xd   : > { %p736_p7 = scmp.ge.s32.totalorder %s994_s20, 1  ;;  %p1087_p8 = por %p1249_p5, %p53_p4 }
   0xe   : > { %p158_p9 = scmp.lt.s32.totalorder %s994_s20, 3  ;;  %s996_s29 = smov [#allocation6]  }
   0xf   : > { %s1253_s26 = scalar_select %p1087_p8, 1, 0 }
  0x10   : > { %s1093_s27 = scalar_select %p38_p6, %s982_s17, %s40_s23  }
  0x11   : > { %p1095_p10 = pnand %p736_p7, %p158_p9  ;;  %s183_s30 = sshll.u32 %s996_s29, 4  ;;  %s184_s30 = int_to_ptr.vmem [resolvable:$true] %s183_s30 }
  0x12   : > { %s862_s8 = scalar_lea.hbm %s1246_s2, 512 }
  0x13   : > { %s1254_s28 = scalar_select %p1095_p10, 1, 0 }
  0x14   : > { %p783_p11 = pneg %p1095_p10  ;;  %p863_p13 = scmp.ne.s32.totalorder %s1246_s2, %s862_s8 }
  0x15   : > { %p869_p4 = scmp.lt.u32.totalorder %s862_s8, %s1246_s2 }
  0x16   : > { %p1103_p12 = pnand %p783_p11, %p1249_p5 }
  0x18   : > { %p864_p0 = pneg %p1103_p12 }
  0x1a   : > { %p865_p1 = pnand %p864_p0, %p863_p13 }
  0x1c   : > { %p866_p2 = pneg %p865_p1 }
  0x1e   : > { %p871_p6 = pnand %p869_p4, %p866_p2 }
  0x20   : > { %874 = shalt.err (!%p871_p6)
}
  0x21   : > { %s875_s13 = scalar_lea.vmem %s184_s30, 512  ;;  %p883_p5 = scmp.lt.s32.totalorder %s184_s30, %s184_s30 }
  0x22   : > { %p876_p7 = scmp.ne.s32.totalorder %s184_s30, %s875_s13  ;;  %p884_p8 = scmp.lt.s32.totalorder %s875_s13, %s875_s13 }
  0x24   : > { %p878_p9 = pnand %p876_p7, %p864_p0  ;;  %p885_p10 = por %p884_p8, %p883_p5 }
  0x26   : > { %p879_p11 = pneg %p878_p9 }
  0x28   : > { %p886_p3 = pnand %p885_p10, %p879_p11 }
  0x2a   : > { %889 = shalt.err (!%p886_p3)
}
  0x2b   : > { %s997_s14 = smov 128   ;;  %s998_s15 = smov 8  }
  0x2c   : > { %786 = dma.hbm_to_vmem [thread:$0]  (!%p1103_p12), %s1246_s2, 512, %s184_s30, [#allocation7], %s997_s14, %s997_s14, %s998_s15  }
  0x2d   : > { %p739_p13 = scmp.ge.s32.totalorder %s994_s20, 2 }
  0x2e   : > { %p1256_p1 = scmp.ne.s32.totalorder (!%p739_p13), %s1252_s24, 0 }
  0x2f   : > { %196 = sbr.rel (%p739_p13) target bundleno = 86 (0x56), region = 28 }
  0x36   : > { %199 = sbr.rel (!%p1256_p1) target bundleno = 86 (0x56), region = 32  ;;  %s200_s29 = sand.u32 (%p1256_p1), 1, %s982_s17  }
  0x37   : > { %s740_s6 = sshll.u32 (%p1256_p1), %s200_s29, 5  ;;  %s1127_s7 = scalar_lea.sflag (%p1256_p1), [#allocation4], %s200_s29 }
  0x38   : > { %s204_s8 = scalar_lea.vmem (%p1256_p1), [#allocation3], %s740_s6 }
  0x3d   : > { %210 = vsyncadd %s1127_s7, 384  ;;  %s741_s5 = sshll.u32 %s990_s19, 6  ;;  %s217_s9 = sshll.u32 %s204_s8, 4  ;;  %s1136_s9 = int_to_ptr.vmem [resolvable:$true] %s217_s9 }
  0x3e   : > { %s1134_s30 = scalar_lea.hbm %s1244_s0, %s741_s5  ;;  %s892_s14 = scalar_lea.hbm %s1244_s0, 256 }
  0x3f   : > { %s890_s24 = scalar_lea.hbm %s1134_s30, 128  ;;  %p893_p5 = scmp.lt.u32.totalorder %s1134_s30, %s1244_s0 }
  0x40   : > { %p891_p3 = scmp.ne.s32.totalorder %s1134_s30, %s890_s24  ;;  %p894_p8 = scmp.lt.u32.totalorder %s892_s14, %s890_s24 }
  0x41   : > { %p896_p12 = scmp.lt.u32.totalorder %s890_s24, %s1134_s30 }
  0x42   : > { %p895_p10 = por %p894_p8, %p893_p5 }
  0x44   : > { %p897_p0 = por %p896_p12, %p895_p10 }
  0x46   : > { %p898_p2 = pnand %p897_p0, %p891_p3 }
  0x48   : > { %901 = shalt.err (!%p898_p2)
}
  0x49   : > { %s902_s25 = scalar_lea.vmem %s1136_s9, 128  ;;  %s999_s29 = smov [#allocation3]  }
  0x4a   : > { %p903_p4 = scmp.ne.s32.totalorder %s1136_s9, %s902_s25  ;;  %s904_s6 = sshll.u32 %s999_s29, 4  ;;  %s905_s6 = int_to_ptr.vmem [resolvable:$false] %s904_s6 }
  0x4b   : > { %s906_s8 = scalar_lea.vmem %s905_s6, 1024  ;;  %p907_p6 = scmp.lt.s32.totalorder %s1136_s9, %s905_s6 }
  0x4c   : > { %p908_p7 = scmp.lt.s32.totalorder %s906_s8, %s902_s25 }
  0x4e   : > { %p909_p9 = por %p908_p7, %p907_p6 }
  0x50   : > { %p910_p11 = pnand %p909_p9, %p903_p4 }
  0x52   : > { %913 = shalt.err (!%p910_p11)
}
  0x53   : > { %s1000_s5 = smov 128   ;;  %s1001_s10 = smov 64  }
  0x54   : > { %s1002_s11 = smov 4  }
  0x55   : > { %223 = dma.hbm_to_vmem [thread:$0]  %s1134_s30, 128, %s1136_s9, %s1127_s7, %s1000_s5, %s1001_s10, %s1002_s11  }
  0x56 PF: > { %p1257_p13 = scmp.ne.s32.totalorder %s1254_s28, 0 }
  0x57   : > { %s231_s24 = sand.u32 (!%p1257_p13), 1, %s978_s16   ;;  %p1258_p1 = scmp.ne.s32.totalorder (!%p1257_p13), %s1253_s26, 0 }
  0x58   : > { %229 = sbr.rel (%p1257_p13) target bundleno = 702 (0x2be), region = 36  ;;  %s743_s12 = sshll.u32 (!%p1257_p13), %s231_s24, 5 }
  0x59   : > { %s232_s13 = scalar_lea.sflag (!%p1257_p13), [#allocation4], %s231_s24  ;;  %s1157_s14 = scalar_lea.vmem (!%p1257_p13), [#allocation3], %s743_s12 }
  0x5f   : > { %961 = dma.done.wait (%p1258_p1), %s232_s13, 512  }
  0x60   : > { %963 = vsyncadd (%p1258_p1), %s232_s13, 4294966784  ;;  %p1259_p3 = scmp.eq.s32.totalorder %s1067_s21, 0 }
  0x62   : > { %965 = dma.done.wait (%p1259_p3), [#allocation7], 512   ;;  %p1260_p5 = pmov %p1259_p3 }
  0x63   : > { %p745_p8 = scmp.ne.s32.totalorder %s986_s18, 0 }
  0x64   : > { %967 = vsyncadd (%p1260_p5), [#allocation7], 4294966784  ;;  %vm287_vm0 = vcmask (!%p745_p8), 261120   ;;  %v1003_v0 = vmov (!%p745_p8), 0.0  }
  0x65   : > { %286 = sbr.rel (%p745_p8) target bundleno = 108 (0x6c), region = 48  ;;  %288 = vst.msk [vmem:[#allocation2] sm:$0xff] (!%p745_p8), %vm287_vm0, %v1003_v0 }
  0x6c PF: > { %v298_v1 = vlaneseq  ;;  %v1004_v2 = vmov 0   ;;  %v1005_v3 = vmov 1966171168   ;;  %v1171_v5 = vld [vmem:[%s1245_s1] sm:$0xff]  ;;  %s746_s7 = sshll.u32 %s986_s18, 3  ;;  %vm441_vm3 = vcmask 261120  }
  0x6d   : > { %854 = vset.pattern.permute.xlu0 %v1004_v2  ;;  %v305_v4 = vunpack.c.l.s4 %v1005_v3  ;;  %855 = vset.pattern.permute.xlu1 %v1004_v2  ;;  %v303_v8 = vcombine.high %v1171_v5, %v1171_v5  ;;  %v301_v31 = vstv %s746_s7  ;;  %v290_v33 = vld [vmem:[%s1157_s14] sm:$0xf]  ;;  %v292_v35 = vld [vmem:[%s1157_s14 + $0x8] sm:$0xf]  ;;  %v291_v39 = vld [vmem:[%s1157_s14 + $0x4] sm:$0xf] }
  0x6e   : > { %v299_v6 = vshrl.u32 %v298_v1, 7  ;;  %v295_v44 = vld [vmem:[%s1157_s14 + $0x14] sm:$0xf]  ;;  %v294_v50 = vld [vmem:[%s1157_s14 + $0x10] sm:$0xf]  ;;  %p747_p10 = scmp.ne.s32.totalorder %s986_s18, 1 }
  0x6f   : > { %v306_v7 = vunpack.c.0.s8 %v305_v4  ;;  %v293_v61 = vld [vmem:[%s1157_s14 + $0xc] sm:$0xf]  ;;  %v296_v4 = vld [vmem:[%s1157_s14 + $0x18] sm:$0xf] }
  0x70   : > { %v354_v11 = vsub.s32 0, %v299_v6  ;;  %v1177_v32 = vadd.s32 %v301_v31, %v299_v6 }
  0x71   : > { %v309_v9 = vsub.s32 %v306_v7, %v299_v6 }
  0x73   : > { %v310_v10 = vrot.slane %v1171_v5, %v309_v9  ;;  %v317_v12 = vrot.slane %v303_v8, %v309_v9 }
  0x75   : > { %v326_v13 = vrot.slane %v310_v10, %v309_v9  ;;  %v318_v14 = vcombine.high %v310_v10, %v310_v10  ;;  %v319_v15 = vcombine.high %v317_v12, %v317_v12  ;;  %v333_v22 = vrot.slane %v317_v12, %v309_v9  ;;  %v297_v12 = vld [vmem:[%s1157_s14 + $0x1c] sm:$0xf] }
  0x77   : > { %v355_v16 = vrot.slane %v326_v13, %v354_v11  ;;  %v348_v17 = vcombine.high %v326_v13, %v326_v13  ;;  %v340_v18 = vrot.slane %v318_v14, %v309_v9  ;;  %v347_v19 = vrot.slane %v319_v15, %v309_v9 }
  0x78   : > { %v371_v25 = vrot.slane %v333_v22, %v354_v11  ;;  %v349_v26 = vcombine.high %v333_v22, %v333_v22 }
  0x79   : > { %385 = vperm.xlu0 %854, %v355_v16   ;;  %v363_v20 = vrot.slane %v348_v17, %v354_v11  ;;  %v359_v21 = vrot.slane %v340_v18, %v354_v11  ;;  %v375_v23 = vrot.slane %v347_v19, %v354_v11  ;;  %v350_v24 = vcombine.high %v340_v18, %v340_v18 }
  0x7a   : > { %v351_v28 = vcombine.high %v347_v19, %v347_v19  ;;  %v379_v29 = vrot.slane %v349_v26, %v354_v11 }
  0x7b   : > { %391 = vperm.xlu1 %855, %v363_v20   ;;  %v367_v27 = vrot.slane %v350_v24, %v354_v11 }
  0x7c   : > { %v383_v30 = vrot.slane %v351_v28, %v354_v11 }
  0x7d   : > { %388 = vperm.xlu0 %854, %v359_v21  }
  0x7f   : > { %400 = vperm.xlu1 %855, %v375_v23  }
  0x81   : > { %397 = vperm.xlu0 %854, %v371_v25  }
  0x83   : > { %394 = vperm.xlu1 %855, %v367_v27  }
  0x85   : > { %403 = vperm.xlu0 %854, %v379_v29  }
  0x87   : > { %406 = vperm.xlu1 %855, %v383_v30  }
  0xf8   : > { %v386_v34 = vpop.permute.xlu0 %385 }
  0xf9   : > { %vm408_vm1 = vcmp.lt.s32.totalorder %v1177_v32, %v386_v34 }
  0xfa   : > { %vm416_vm2 = vmpackc.low %vm408_vm1, %vm408_vm1  ;;  %v392_v36 = vpop.permute.xlu1 %391 }
  0xfb   : > { %v424_v37 = vsel %vm416_vm2, %v290_v33, 0  ;;  %vm410_vm4 = vcmp.lt.s32.totalorder %v1177_v32, %v392_v36  ;;  %vm506_vm2 = vcmask 1041409  }
  0xfc   : > { %v433_v38 = vunpack.c.l.bf16 %v424_v37  ;;  %vm418_vm5 = vmpackc.low %vm410_vm4, %vm410_vm4  ;;  %v389_v40 = vpop.permute.xlu0 %388  ;;  %vm508_vm4 = vcmask 1042434  }
  0xfd   : > { %v426_v41 = vsel %vm418_vm5, %v292_v35, 0  ;;  %vm409_vm6 = vcmp.lt.s32.totalorder %v1177_v32, %v389_v40  ;;  %vm510_vm5 = vcmask 1043459  }
  0xfe   : > { %v442_v42 = vsel %vm441_vm3, %v433_v38, 0.0  ;;  %v435_v43 = vunpack.c.l.bf16 %v426_v41  ;;  %vm417_vm7 = vmpackc.low %vm409_vm6, %vm409_vm6  ;;  %v401_v45 = vpop.permute.xlu1 %400  ;;  %vm512_vm6 = vcmask 1044484  }
  0xff   : > { %v443_v46 = vrot.slane %v442_v42, 4  ;;  %v425_v47 = vsel %vm417_vm7, %v291_v39, 0  ;;  %vm413_vm8 = vcmp.lt.s32.totalorder %v1177_v32, %v401_v45  ;;  %vm514_vm7 = vcmask 1045509  }
 0x100   : > { %v456_v48 = vsel %vm441_vm3, %v435_v43, 0.0  ;;  %v434_v49 = vunpack.c.l.bf16 %v425_v47  ;;  %vm421_vm9 = vmpackc.low %vm413_vm8, %vm413_vm8  ;;  %v398_v51 = vpop.permute.xlu0 %397  ;;  %vm516_vm8 = vcmask 1046534  }
 0x101   : > { %v444_v52 = vadd.f32 %v443_v46, %v442_v42  ;;  %v457_v53 = vrot.slane %v456_v48, 4  ;;  %v429_v54 = vsel %vm421_vm9, %v295_v44, 0  ;;  %vm412_vm10 = vcmp.lt.s32.totalorder %v1177_v32, %v398_v51 }
 0x102   : > { %v449_v55 = vsel %vm441_vm3, %v434_v49, 0.0  ;;  %v438_v56 = vunpack.c.l.bf16 %v429_v54  ;;  %vm420_vm11 = vmpackc.low %vm412_vm10, %vm412_vm10  ;;  %v395_v57 = vpop.permute.xlu1 %394  ;;  %vm518_vm9 = vcmask 1047559   ;;  %vm1007_vm10 = vmmov (!%p747_p10), 0  }
 0x103   : > { %v458_v58 = vadd.f32 %v457_v53, %v456_v48  ;;  %v450_v59 = vrot.slane %v449_v55, 4  ;;  %v428_v60 = vsel %vm420_vm11, %v294_v50, 0  ;;  %vm411_vm12 = vcmp.lt.s32.totalorder %v1177_v32, %v395_v57 }
 0x104   : > { %v477_v62 = vsel %vm441_vm3, %v438_v56, 0.0  ;;  %v437_v63 = vunpack.c.l.bf16 %v428_v60  ;;  %v404_v0 = vpop.permute.xlu0 %403  ;;  %v445_v1 = vrot.slane %v444_v52, 2  ;;  %vm419_vm13 = vmpackc.low %vm411_vm12, %vm411_vm12 }
 0x105   : > { %v451_v2 = vadd.f32 %v450_v59, %v449_v55  ;;  %v478_v3 = vrot.slane %v477_v62, 4  ;;  %v427_v7 = vsel %vm419_vm13, %v293_v61, 0  ;;  %vm414_vm14 = vcmp.lt.s32.totalorder %v1177_v32, %v404_v0 }
 0x106   : > { %v470_v6 = vsel %vm441_vm3, %v437_v63, 0.0  ;;  %v407_v8 = vpop.permute.xlu1 %406  ;;  %v459_v9 = vrot.slane %v458_v58, 2  ;;  %vm422_vm15 = vmpackc.low %vm414_vm14, %vm414_vm14  ;;  %v436_v14 = vunpack.c.l.bf16 %v427_v7  ;;  %v446_v16 = vadd.f32 %v445_v1, %v444_v52  ;;  %v432_v63 = vld [vmem:[#allocation2] sm:$0xff] }
 0x107   : > { %v452_v10 = vrot.slane %v451_v2, 2  ;;  %v479_v11 = vadd.f32 %v478_v3, %v477_v62  ;;  %v471_v13 = vrot.slane %v470_v6, 4  ;;  %v430_v15 = vsel %vm422_vm15, %v296_v4, 0  ;;  %v530_v3 = vld [vmem:[#allocation6] sm:$0xff] (!%p747_p10)  ;;  %v531_v4 = vld [vmem:[#allocation6 + $0x8] sm:$0xff] (!%p747_p10) }
 0x108   : > { %vm415_vm0 = vcmp.lt.s32.totalorder %v1177_v32, %v407_v8  ;;  %v463_v19 = vsel %vm441_vm3, %v436_v14, 0.0  ;;  %v439_v20 = vunpack.c.l.bf16 %v430_v15  ;;  %v460_v25 = vadd.f32 %v459_v9, %v458_v58 }
 0x109   : > { %v453_v17 = vadd.f32 %v452_v10, %v451_v2  ;;  %vm423_vm1 = vmpackc.low %vm415_vm0, %vm415_vm0  ;;  %v472_v18 = vadd.f32 %v471_v13, %v470_v6  ;;  %v480_v23 = vrot.slane %v479_v11, 2  ;;  %v464_v24 = vrot.slane %v463_v19, 4  ;;  %v532_v6 = vld [vmem:[#allocation6 + $0x10] sm:$0xff] (!%p747_p10)  ;;  %v533_v10 = vld [vmem:[#allocation6 + $0x18] sm:$0xff] (!%p747_p10) }
 0x10a   : > { %v431_v21 = vsel %vm423_vm1, %v297_v12, 0  ;;  %v484_v27 = vsel %vm441_vm3, %v439_v20, 0.0  ;;  %v447_v29 = vrot.slane %v446_v16, 1  ;;  %v461_v38 = vrot.slane %v460_v25, 1 }
 0x10b   : > { %v454_v22 = vrot.slane %v453_v17, 1  ;;  %v473_v26 = vrot.slane %v472_v18, 2  ;;  %v440_v28 = vunpack.c.l.bf16 %v431_v21  ;;  %v465_v30 = vadd.f32 %v464_v24, %v463_v19 }
 0x10c   : > { %v485_v31 = vrot.slane %v484_v27, 4  ;;  %v481_v35 = vadd.f32 %v480_v23, %v479_v11  ;;  %v448_v40 = vadd.f32 %v447_v29, %v446_v16  ;;  %v462_v49 = vadd.f32 %v461_v38, %v460_v25 }
 0x10d   : > { %v474_v32 = vadd.f32 %v473_v26, %v472_v18  ;;  %v491_v33 = vsel %vm441_vm3, %v440_v28, 0.0  ;;  %v455_v34 = vadd.f32 %v454_v22, %v453_v17  ;;  %v466_v36 = vrot.slane %v465_v30, 2  ;;  %v749_v18 = vld [vmem:[%s1247_s3] ss:$0 sm:$0xff] (!%p747_p10) }
 0x10e   : > { %v486_v37 = vadd.f32 %v485_v31, %v484_v27  ;;  %v492_v39 = vrot.slane %v491_v33, 4  ;;  %v482_v46 = vrot.slane %v481_v35, 1  ;;  %v527_v7 = vcvt.s32.f32 (!%p747_p10), %v1171_v5 }
 0x10f   : > { %v467_v41 = vadd.f32 %v466_v36, %v465_v30  ;;  %v475_v43 = vrot.slane %v474_v32, 1  ;;  %v507_v45 = vsel %vm506_vm2, %v455_v34, %v448_v40  ;;  %v1006_v8 = vmov (!%p747_p10), 0.0|0.0  }
 0x110   : > { %v487_v42 = vrot.slane %v486_v37, 2  ;;  %v493_v44 = vadd.f32 %v492_v39, %v491_v33  ;;  %v509_v54 = vsel %vm508_vm4, %v462_v49, %v507_v45  ;;  %v483_v56 = vadd.f32 %v482_v46, %v481_v35  ;;  %770 = vmatprep.subr.bf16.mxu0 (!%p747_p10), %v1006_v8 }
 0x111   : > { %v468_v47 = vrot.slane %v467_v41, 1  ;;  %v476_v53 = vadd.f32 %v475_v43, %v474_v32  ;;  %v771_v9 = vpack.c.bf16 (!%p747_p10), %v531_v4, %v530_v3  ;;  %v1008_v11 = vmov (!%p747_p10), 0.0  }
 0x112   : > { %v488_v48 = vadd.f32 %v487_v42, %v486_v37  ;;  %v494_v50 = vrot.slane %v493_v44, 2  ;;  %767 = vmatprep.mubr.msk.f32.mxu0 (!%p747_p10), %vm1007_vm10, %v1008_v11  ;;  %v1009_v12 = vmov (!%p747_p10), 0   ;;  %v528_v13 = vmax.f32 (!%p747_p10), %v527_v7, 1.0 }
 0x113   : > { %v469_v51 = vadd.f32 %v468_v47, %v467_v41  ;;  %857 = vset.pattern.permute.xlu0 (!%p747_p10), %v1009_v12  ;;  %772 = vmatpush3.bf16.msra.mxu0 (!%p747_p10), %v771_v9  ;;  %v774_v14 = vpack.c.bf16 (!%p747_p10), %v533_v10, %v532_v6 }
 0x114   : > { %v489_v52 = vrot.slane %v488_v48, 1  ;;  %v495_v55 = vadd.f32 %v494_v50, %v493_v44  ;;  %773 = vmatprep.subr.bf16.mxu0 (!%p747_p10), %v1006_v8  ;;  %858 = vrcp.f32 (!%p747_p10), %v528_v13 }
 0x115   : > { %v511_v57 = vsel %vm510_vm5, %v469_v51, %v509_v54 }
 0x116   : > { %v490_v58 = vadd.f32 %v489_v52, %v488_v48  ;;  %v513_v59 = vsel %vm512_vm6, %v476_v53, %v511_v57  ;;  %v496_v60 = vrot.slane %v495_v55, 1 }
 0x117   : > { %v515_v61 = vsel %vm514_vm7, %v483_v56, %v513_v59  ;;  %526 = sbr.rel (%p747_p10) target bundleno = 670 (0x29e), region = 52  ;;  %775 = vmatpush3.bf16.msra.mxu0 (!%p747_p10), %v774_v14 }
 0x118   : > { %v517_v62 = vsel %vm516_vm8, %v490_v58, %v515_v61  ;;  %v497_v0 = vadd.f32 %v496_v60, %v495_v55 }
 0x11a   : > { %v519_v1 = vsel %vm518_vm9, %v497_v0, %v517_v62 }
 0x11b   : > { %v521_v2 = vadd.f32 %v519_v1, %v432_v63 }
 0x11d   : > { %522 = vst.msk [vmem:[#allocation2] sm:$0xff] %vm441_vm3, %v521_v2 }
 0x11e   : > { %v859_v16 = vpop.eup %858 }
 0x11f   : > { %611 = vperm.xlu0 %857, %v859_v16  }
 0x124   : > { %v529_v15 = vld [vmem:[#allocation2] sm:$0xff] }
 0x125   : > { %768 = vmatmul.mubr.msk.f32.vlgmr.msra.gmra.mrb[0].mxu0 %vm441_vm3, %v529_v15 }
 0x19e   : > { %v612_v5 = vpop.permute.xlu0 %611 }
 0x1f8   : > { %v603_v17 = vpop.f32.mrb[0].mxu0 }
 0x1f9   : > { %v614_v19 = vmul.f32 %v612_v5, %v603_v17  ;;  %v769_v20 = vpop.f32.mrb[1].mxu0 }
 0x1fb   : > { %v622_v21 = vadd.f32 %v749_v18, %v614_v19 }
 0x1fd   : > { %v623_v22 = vmul.f32 %v622_v21, %v622_v21 }
 0x1ff   : > { %v624_v23 = vsel %vm441_vm3, %v623_v22, 0.0 }
 0x200   : > { %625 = vadd.xlane.f32.xlu0 %v624_v23 }
 0x28d   : > { %v626_v24 = vpop.xlane.xlu0 %625 }
 0x28e   : > { %v627_v25 = vmax.f32 %v626_v24, 1e-24 }
 0x290   : > { %860 = vrsqrt.f32 %v627_v25 }
 0x29a   : > { %v861_v26 = vpop.eup %860 }
 0x29b   : > { %v629_v27 = vmul.f32 %v861_v26, %v622_v21 }
 0x29d   : > { %630 = vst.msk [vmem:[#allocation8] sm:$0xff] %vm441_vm3, %v629_v27 }
 0x29e PF: > { %p750_p12 = scmp.ne.s32.totalorder %s1067_s21, 1 }
 0x2a0   : > { %633 = sbr.rel (%p750_p12) target bundleno = 698 (0x2ba), region = 56 }
 0x2a7   : > { %639 = vsyncadd [#allocation5], 96  ;;  %s1010_s30 = smov [#allocation8]  }
 0x2a8   : > { %s644_s15 = sshll.u32 %s1010_s30, 4  ;;  %s645_s15 = int_to_ptr.vmem [resolvable:$true] %s644_s15 }
 0x2a9   : > { %s914_s23 = scalar_lea.vmem %s645_s15, 32  ;;  %s918_s25 = scalar_lea.vmem %s645_s15, 128 }
 0x2aa   : > { %p915_p0 = scmp.ne.s32.totalorder %s645_s15, %s914_s23  ;;  %p919_p2 = scmp.lt.s32.totalorder %s645_s15, %s645_s15 }
 0x2ab   : > { %p920_p4 = scmp.lt.s32.totalorder %s918_s25, %s914_s23 }
 0x2ad   : > { %p921_p6 = por %p920_p4, %p919_p2 }
 0x2af   : > { %p922_p7 = pnand %p921_p6, %p915_p0 }
 0x2b1   : > { %925 = shalt.err (!%p922_p7)
}
 0x2b2   : > { %s926_s8 = scalar_lea.hbm %s1248_s4, 32 }
 0x2b3   : > { %p927_p9 = scmp.ne.s32.totalorder %s1248_s4, %s926_s8  ;;  %p930_p11 = scmp.lt.u32.totalorder %s926_s8, %s1248_s4 }
 0x2b5   : > { %p932_p13 = pnand %p930_p11, %p927_p9 }
 0x2b7   : > { %935 = shalt.err (!%p932_p13)
}
 0x2b8   : > { %s1011_s12 = smov 32   ;;  %s1012_s13 = smov 2  }
 0x2b9   : > { %650 = dma.vmem_to_hbm [thread:$0]  %s645_s15, 32, %s1248_s4, [#allocation5], %s1011_s12, %s1011_s12, %s1012_s13  }
 0x2ba PF: > { %p789_p1 = scmp.eq.s32.totalorder %s1067_s21, 1 }
 0x2bc   : > { %969 = dma.done.wait (%p789_p1), [#allocation5], 128  }
 0x2bd   : > { %971 = vsyncadd (%p789_p1), [#allocation5], 4294967168 }
 0x2be PF: > { %s19_s20 = sadd.s32 1, %s994_s20   ;;  %s1261_s15 = smov %s978_s16 }
 0x2bf   : > { %p16_p3 = scmp.ge.s32.totalorder %s19_s20, 4   ;;  %s1262_s16 = smov %s982_s17 }
 0x2c0   : > { %s1263_s17 = smov %s1093_s27  ;;  %s1264_s18 = smov %s990_s19 }
 0x2c1   : > { %s1265_s19 = smov %s1267_s22  ;;  %18 = sbr.rel (!%p16_p3) target bundleno = 6 (0x6), region = 89 }
 0x2c8   :  { %660 = vsyncpa [#allocation4], 1 }
 0x2c9   :  { %662 = vsyncpa [#allocation4 + $0x1], 1 }
 0x2ca   :  { %663 = vsyncpa [#allocation7], 1 }
 0x2cb   :  { %664 = vsyncpa [#allocation5], 1 }
 0x2cc   :  { %666 = vsyncpa [#allocation5 + $0x1], 1 }

// kernel: tpu_custom_call.1
= control target key start
LH: loop header
LB: loop body
LE: loop exit
PB: predicated region body
PF: predicated region fallthrough
CT: control target
= control target key end

     0   :  { %9 = vsyncpa [#allocation4], 0  ;;  %s1244_s0 = inlined_call_operand.hbm [shape: bf16[2,16,32], index: 0, kind: input, shape index: {}]   ;;  %s1245_s1 = inlined_call_operand.vmem [shape: s32[2,1], index: 1, kind: input, shape index: {}]   ;;  %s1246_s2 = inlined_call_operand.hbm [shape: f32[32,32], index: 2, kind: input, shape index: {}]   ;;  %s1247_s3 = inlined_call_operand.vmem [shape: f32[1,32], index: 3, kind: input, shape index: {}]   ;;  %s1248_s4 = inlined_call_operand.hbm [shape: f32[2,32], index: 4, kind: output, shape index: {}]  }
   0x1   :  { %11 = vsyncpa [#allocation4 + $0x1], 0 }
   0x2   :  { %12 = vsyncpa [#allocation7], 0 }
   0x3   :  { %13 = vsyncpa [#allocation5], 0  ;;  %s1038_s15 = smov 0   ;;  %s1040_s16 = smov 0  }
   0x4   :  { %s1042_s17 = smov 0   ;;  %s1044_s18 = smov 0  }
   0x5   :  { %s1046_s19 = smov 0   ;;  %s1048_s20 = smov 0  }
   0x6 LB: > { %s1067_s21 = sadd.s32 4294967295, %s994_s20   ;;  %s28_s22 = sadd.s32 1, %s990_s19  ;;  %s994_s20 = sphi %s1048_s20, %s19_s20   ;;  %s990_s19 = sphi %s1046_s19, %s1265_s19   ;;  %s986_s18 = sphi %s1044_s18, %s1264_s18   ;;  %s982_s17 = sphi %s1042_s17, %s1263_s17   ;;  %s978_s16 = sphi %s1040_s16, %s1262_s16   ;;  %s974_s15 = sphi %s1038_s15, %s1261_s15  }
   0x7   : > { %p29_p0 = scmp.ge.s32.totalorder %s28_s22, 2  ;;  %s40_s23 = sadd.s32 1, %s982_s17 }
   0x8   : > { %p47_p1 = scmp.ne.s32.totalorder %s982_s17, %s978_s16  ;;  %p48_p2 = scmp.eq.s32.totalorder %s994_s20, 0 }
   0x9   : > { %s1267_s22 = smov (%p29_p0, %s28_s22), 0  ;;  %p53_p4 = scmp.ne.s32.totalorder %s978_s16, %s974_s15 }
   0xa   : > { %p1076_p3 = por %p48_p2, %p47_p1  ;;  %s36_s25 = ssub.s32 %s990_s19, %s1267_s22 }
   0xb   : > { %p1249_p5 = scmp.eq.s32.totalorder %s1067_s21, 0  ;;  %p38_p6 = scmp.eq.s32.totalorder %s36_s25, 0 }
   0xc   : > { %s1252_s24 = scalar_select %p1076_p3, 1, 0 }
   0xd   : > { %p736_p7 = scmp.ge.s32.totalorder %s994_s20, 1  ;;  %p1087_p8 = por %p1249_p5, %p53_p4 }
   0xe   : > { %p158_p9 = scmp.lt.s32.totalorder %s994_s20, 3  ;;  %s996_s29 = smov [#allocation6]  }
   0xf   : > { %s1253_s26 = scalar_select %p1087_p8, 1, 0 }
  0x10   : > { %s1093_s27 = scalar_select %p38_p6, %s982_s17, %s40_s23  }
  0x11   : > { %p1095_p10 = pnand %p736_p7, %p158_p9  ;;  %s183_s30 = sshll.u32 %s996_s29, 4  ;;  %s184_s30 = int_to_ptr.vmem [resolvable:$true] %s183_s30 }
  0x12   : > { %s862_s8 = scalar_lea.hbm %s1246_s2, 512 }
  0x13   : > { %s1254_s28 = scalar_select %p1095_p10, 1, 0 }
  0x14   : > { %p783_p11 = pneg %p1095_p10  ;;  %p863_p13 = scmp.ne.s32.totalorder %s1246_s2, %s862_s8 }
  0x15   : > { %p869_p4 = scmp.lt.u32.totalorder %s862_s8, %s1246_s2 }
  0x16   : > { %p1103_p12 = pnand %p783_p11, %p1249_p5 }
  0x18   : > { %p864_p0 = pneg %p1103_p12 }
  0x1a   : > { %p865_p1 = pnand %p864_p0, %p863_p13 }
  0x1c   : > { %p866_p2 = pneg %p865_p1 }
  0x1e   : > { %p871_p6 = pnand %p869_p4, %p866_p2 }
  0x20   : > { %874 = shalt.err (!%p871_p6)
}
  0x21   : > { %s875_s13 = scalar_lea.vmem %s184_s30, 512  ;;  %p883_p5 = scmp.lt.s32.totalorder %s184_s30, %s184_s30 }
  0x22   : > { %p876_p7 = scmp.ne.s32.totalorder %s184_s30, %s875_s13  ;;  %p884_p8 = scmp.lt.s32.totalorder %s875_s13, %s875_s13 }
  0x24   : > { %p878_p9 = pnand %p876_p7, %p864_p0  ;;  %p885_p10 = por %p884_p8, %p883_p5 }
  0x26   : > { %p879_p11 = pneg %p878_p9 }
  0x28   : > { %p886_p3 = pnand %p885_p10, %p879_p11 }
  0x2a   : > { %889 = shalt.err (!%p886_p3)
}
  0x2b   : > { %s997_s14 = smov 128   ;;  %s998_s15 = smov 8  }
  0x2c   : > { %786 = dma.hbm_to_vmem [thread:$0]  (!%p1103_p12), %s1246_s2, 512, %s184_s30, [#allocation7], %s997_s14, %s997_s14, %s998_s15  }
  0x2d   : > { %p739_p13 = scmp.ge.s32.totalorder %s994_s20, 2 }
  0x2e   : > { %p1256_p1 = scmp.ne.s32.totalorder (!%p739_p13), %s1252_s24, 0 }
  0x2f   : > { %196 = sbr.rel (%p739_p13) target bundleno = 86 (0x56), region = 28 }
  0x36   : > { %199 = sbr.rel (!%p1256_p1) target bundleno = 86 (0x56), region = 32  ;;  %s200_s29 = sand.u32 (%p1256_p1), 1, %s982_s17  }
  0x37   : > { %s740_s6 = sshll.u32 (%p1256_p1), %s200_s29, 5  ;;  %s1127_s7 = scalar_lea.sflag (%p1256_p1), [#allocation4], %s200_s29 }
  0x38   : > { %s204_s8 = scalar_lea.vmem (%p1256_p1), [#allocation3], %s740_s6 }
  0x3d   : > { %210 = vsyncadd %s1127_s7, 384  ;;  %s741_s5 = sshll.u32 %s990_s19, 6  ;;  %s217_s9 = sshll.u32 %s204_s8, 4  ;;  %s1136_s9 = int_to_ptr.vmem [resolvable:$true] %s217_s9 }
  0x3e   : > { %s1134_s30 = scalar_lea.hbm %s1244_s0, %s741_s5  ;;  %s892_s14 = scalar_lea.hbm %s1244_s0, 256 }
  0x3f   : > { %s890_s24 = scalar_lea.hbm %s1134_s30, 128  ;;  %p893_p5 = scmp.lt.u32.totalorder %s1134_s30, %s1244_s0 }
  0x40   : > { %p891_p3 = scmp.ne.s32.totalorder %s1134_s30, %s890_s24  ;;  %p894_p8 = scmp.lt.u32.totalorder %s892_s14, %s890_s24 }
  0x41   : > { %p896_p12 = scmp.lt.u32.totalorder %s890_s24, %s1134_s30 }
  0x42   : > { %p895_p10 = por %p894_p8, %p893_p5 }
  0x44   : > { %p897_p0 = por %p896_p12, %p895_p10 }
  0x46   : > { %p898_p2 = pnand %p897_p0, %p891_p3 }
  0x48   : > { %901 = shalt.err (!%p898_p2)
}
  0x49   : > { %s902_s25 = scalar_lea.vmem %s1136_s9, 128  ;;  %s999_s29 = smov [#allocation3]  }
  0x4a   : > { %p903_p4 = scmp.ne.s32.totalorder %s1136_s9, %s902_s25  ;;  %s904_s6 = sshll.u32 %s999_s29, 4  ;;  %s905_s6 = int_to_ptr.vmem [resolvable:$false] %s904_s6 }
  0x4b   : > { %s906_s8 = scalar_lea.vmem %s905_s6, 1024  ;;  %p907_p6 = scmp.lt.s32.totalorder %s1136_s9, %s905_s6 }
  0x4c   : > { %p908_p7 = scmp.lt.s32.totalorder %s906_s8, %s902_s25 }
  0x4e   : > { %p909_p9 = por %p908_p7, %p907_p6 }
  0x50   : > { %p910_p11 = pnand %p909_p9, %p903_p4 }
  0x52   : > { %913 = shalt.err (!%p910_p11)
}
  0x53   : > { %s1000_s5 = smov 128   ;;  %s1001_s10 = smov 64  }
  0x54   : > { %s1002_s11 = smov 4  }
  0x55   : > { %223 = dma.hbm_to_vmem [thread:$0]  %s1134_s30, 128, %s1136_s9, %s1127_s7, %s1000_s5, %s1001_s10, %s1002_s11  }
  0x56 PF: > { %p1257_p13 = scmp.ne.s32.totalorder %s1254_s28, 0 }
  0x57   : > { %s231_s24 = sand.u32 (!%p1257_p13), 1, %s978_s16   ;;  %p1258_p1 = scmp.ne.s32.totalorder (!%p1257_p13), %s1253_s26, 0 }
  0x58   : > { %229 = sbr.rel (%p1257_p13) target bundleno = 702 (0x2be), region = 36  ;;  %s743_s12 = sshll.u32 (!%p1257_p13), %s231_s24, 5 }
  0x59   : > { %s232_s13 = scalar_lea.sflag (!%p1257_p13), [#allocation4], %s231_s24  ;;  %s1157_s14 = scalar_lea.vmem (!%p1257_p13), [#allocation3], %s743_s12 }
  0x5f   : > { %961 = dma.done.wait (%p1258_p1), %s232_s13, 512  }
  0x60   : > { %963 = vsyncadd (%p1258_p1), %s232_s13, 4294966784  ;;  %p1259_p3 = scmp.eq.s32.totalorder %s1067_s21, 0 }
  0x62   : > { %965 = dma.done.wait (%p1259_p3), [#allocation7], 512   ;;  %p1260_p5 = pmov %p1259_p3 }
  0x63   : > { %p745_p8 = scmp.ne.s32.totalorder %s986_s18, 0 }
  0x64   : > { %967 = vsyncadd (%p1260_p5), [#allocation7], 4294966784  ;;  %vm287_vm0 = vcmask (!%p745_p8), 261120   ;;  %v1003_v0 = vmov (!%p745_p8), 0.0  }
  0x65   : > { %286 = sbr.rel (%p745_p8) target bundleno = 108 (0x6c), region = 48  ;;  %288 = vst.msk [vmem:[#allocation2] sm:$0xff] (!%p745_p8), %vm287_vm0, %v1003_v0 }
  0x6c PF: > { %v298_v1 = vlaneseq  ;;  %v1004_v2 = vmov 0   ;;  %v1005_v3 = vmov 1966171168   ;;  %v1171_v5 = vld [vmem:[%s1245_s1] sm:$0xff]  ;;  %s746_s7 = sshll.u32 %s986_s18, 3  ;;  %vm441_vm3 = vcmask 261120  }
  0x6d   : > { %854 = vset.pattern.permute.xlu0 %v1004_v2  ;;  %v305_v4 = vunpack.c.l.s4 %v1005_v3  ;;  %855 = vset.pattern.permute.xlu1 %v1004_v2  ;;  %v303_v8 = vcombine.high %v1171_v5, %v1171_v5  ;;  %v301_v31 = vstv %s746_s7  ;;  %v290_v33 = vld [vmem:[%s1157_s14] sm:$0xf]  ;;  %v292_v35 = vld [vmem:[%s1157_s14 + $0x8] sm:$0xf]  ;;  %v291_v39 = vld [vmem:[%s1157_s14 + $0x4] sm:$0xf] }
  0x6e   : > { %v299_v6 = vshrl.u32 %v298_v1, 7  ;;  %v295_v44 = vld [vmem:[%s1157_s14 + $0x14] sm:$0xf]  ;;  %v294_v50 = vld [vmem:[%s1157_s14 + $0x10] sm:$0xf]  ;;  %p747_p10 = scmp.ne.s32.totalorder %s986_s18, 1 }
  0x6f   : > { %v306_v7 = vunpack.c.0.s8 %v305_v4  ;;  %v293_v61 = vld [vmem:[%s1157_s14 + $0xc] sm:$0xf]  ;;  %v296_v4 = vld [vmem:[%s1157_s14 + $0x18] sm:$0xf] }
  0x70   : > { %v354_v11 = vsub.s32 0, %v299_v6  ;;  %v1177_v32 = vadd.s32 %v301_v31, %v299_v6 }
  0x71   : > { %v309_v9 = vsub.s32 %v306_v7, %v299_v6 }
  0x73   : > { %v310_v10 = vrot.slane %v1171_v5, %v309_v9  ;;  %v317_v12 = vrot.slane %v303_v8, %v309_v9 }
  0x75   : > { %v326_v13 = vrot.slane %v310_v10, %v309_v9  ;;  %v318_v14 = vcombine.high %v310_v10, %v310_v10  ;;  %v319_v15 = vcombine.high %v317_v12, %v317_v12  ;;  %v333_v22 = vrot.slane %v317_v12, %v309_v9  ;;  %v297_v12 = vld [vmem:[%s1157_s14 + $0x1c] sm:$0xf] }
  0x77   : > { %v355_v16 = vrot.slane %v326_v13, %v354_v11  ;;  %v348_v17 = vcombine.high %v326_v13, %v326_v13  ;;  %v340_v18 = vrot.slane %v318_v14, %v309_v9  ;;  %v347_v19 = vrot.slane %v319_v15, %v309_v9 }
  0x78   : > { %v371_v25 = vrot.slane %v333_v22, %v354_v11  ;;  %v349_v26 = vcombine.high %v333_v22, %v333_v22 }
  0x79   : > { %385 = vperm.xlu0 %854, %v355_v16   ;;  %v363_v20 = vrot.slane %v348_v17, %v354_v11  ;;  %v359_v21 = vrot.slane %v340_v18, %v354_v11  ;;  %v375_v23 = vrot.slane %v347_v19, %v354_v11  ;;  %v350_v24 = vcombine.high %v340_v18, %v340_v18 }
  0x7a   : > { %v351_v28 = vcombine.high %v347_v19, %v347_v19  ;;  %v379_v29 = vrot.slane %v349_v26, %v354_v11 }
  0x7b   : > { %391 = vperm.xlu1 %855, %v363_v20   ;;  %v367_v27 = vrot.slane %v350_v24, %v354_v11 }
  0x7c   : > { %v383_v30 = vrot.slane %v351_v28, %v354_v11 }
  0x7d   : > { %388 = vperm.xlu0 %854, %v359_v21  }
  0x7f   : > { %400 = vperm.xlu1 %855, %v375_v23  }
  0x81   : > { %397 = vperm.xlu0 %854, %v371_v25  }
  0x83   : > { %394 = vperm.xlu1 %855, %v367_v27  }
  0x85   : > { %403 = vperm.xlu0 %854, %v379_v29  }
  0x87   : > { %406 = vperm.xlu1 %855, %v383_v30  }
  0xf8   : > { %v386_v34 = vpop.permute.xlu0 %385 }
  0xf9   : > { %vm408_vm1 = vcmp.lt.s32.totalorder %v1177_v32, %v386_v34 }
  0xfa   : > { %vm416_vm2 = vmpackc.low %vm408_vm1, %vm408_vm1  ;;  %v392_v36 = vpop.permute.xlu1 %391 }
  0xfb   : > { %v424_v37 = vsel %vm416_vm2, %v290_v33, 0  ;;  %vm410_vm4 = vcmp.lt.s32.totalorder %v1177_v32, %v392_v36  ;;  %vm506_vm2 = vcmask 1041409  }
  0xfc   : > { %v433_v38 = vunpack.c.l.bf16 %v424_v37  ;;  %vm418_vm5 = vmpackc.low %vm410_vm4, %vm410_vm4  ;;  %v389_v40 = vpop.permute.xlu0 %388  ;;  %vm508_vm4 = vcmask 1042434  }
  0xfd   : > { %v426_v41 = vsel %vm418_vm5, %v292_v35, 0  ;;  %vm409_vm6 = vcmp.lt.s32.totalorder %v1177_v32, %v389_v40  ;;  %vm510_vm5 = vcmask 1043459  }
  0xfe   : > { %v442_v42 = vsel %vm441_vm3, %v433_v38, 0.0  ;;  %v435_v43 = vunpack.c.l.bf16 %v426_v41  ;;  %vm417_vm7 = vmpackc.low %vm409_vm6, %vm409_vm6  ;;  %v401_v45 = vpop.permute.xlu1 %400  ;;  %vm512_vm6 = vcmask 1044484  }
  0xff   : > { %v443_v46 = vrot.slane %v442_v42, 4  ;;  %v425_v47 = vsel %vm417_vm7, %v291_v39, 0  ;;  %vm413_vm8 = vcmp.lt.s32.totalorder %v1177_v32, %v401_v45  ;;  %vm514_vm7 = vcmask 1045509  }
 0x100   : > { %v456_v48 = vsel %vm441_vm3, %v435_v43, 0.0  ;;  %v434_v49 = vunpack.c.l.bf16 %v425_v47  ;;  %vm421_vm9 = vmpackc.low %vm413_vm8, %vm413_vm8  ;;  %v398_v51 = vpop.permute.xlu0 %397  ;;  %vm516_vm8 = vcmask 1046534  }
 0x101   : > { %v444_v52 = vadd.f32 %v443_v46, %v442_v42  ;;  %v457_v53 = vrot.slane %v456_v48, 4  ;;  %v429_v54 = vsel %vm421_vm9, %v295_v44, 0  ;;  %vm412_vm10 = vcmp.lt.s32.totalorder %v1177_v32, %v398_v51 }
 0x102   : > { %v449_v55 = vsel %vm441_vm3, %v434_v49, 0.0  ;;  %v438_v56 = vunpack.c.l.bf16 %v429_v54  ;;  %vm420_vm11 = vmpackc.low %vm412_vm10, %vm412_vm10  ;;  %v395_v57 = vpop.permute.xlu1 %394  ;;  %vm518_vm9 = vcmask 1047559   ;;  %vm1007_vm10 = vmmov (!%p747_p10), 0  }
 0x103   : > { %v458_v58 = vadd.f32 %v457_v53, %v456_v48  ;;  %v450_v59 = vrot.slane %v449_v55, 4  ;;  %v428_v60 = vsel %vm420_vm11, %v294_v50, 0  ;;  %vm411_vm12 = vcmp.lt.s32.totalorder %v1177_v32, %v395_v57 }
 0x104   : > { %v477_v62 = vsel %vm441_vm3, %v438_v56, 0.0  ;;  %v437_v63 = vunpack.c.l.bf16 %v428_v60  ;;  %v404_v0 = vpop.permute.xlu0 %403  ;;  %v445_v1 = vrot.slane %v444_v52, 2  ;;  %vm419_vm13 = vmpackc.low %vm411_vm12, %vm411_vm12 }
 0x105   : > { %v451_v2 = vadd.f32 %v450_v59, %v449_v55  ;;  %v478_v3 = vrot.slane %v477_v62, 4  ;;  %v427_v7 = vsel %vm419_vm13, %v293_v61, 0  ;;  %vm414_vm14 = vcmp.lt.s32.totalorder %v1177_v32, %v404_v0 }
 0x106   : > { %v470_v6 = vsel %vm441_vm3, %v437_v63, 0.0  ;;  %v407_v8 = vpop.permute.xlu1 %406  ;;  %v459_v9 = vrot.slane %v458_v58, 2  ;;  %vm422_vm15 = vmpackc.low %vm414_vm14, %vm414_vm14  ;;  %v436_v14 = vunpack.c.l.bf16 %v427_v7  ;;  %v446_v16 = vadd.f32 %v445_v1, %v444_v52  ;;  %v432_v63 = vld [vmem:[#allocation2] sm:$0xff] }
 0x107   : > { %v452_v10 = vrot.slane %v451_v2, 2  ;;  %v479_v11 = vadd.f32 %v478_v3, %v477_v62  ;;  %v471_v13 = vrot.slane %v470_v6, 4  ;;  %v430_v15 = vsel %vm422_vm15, %v296_v4, 0  ;;  %v530_v3 = vld [vmem:[#allocation6] sm:$0xff] (!%p747_p10)  ;;  %v531_v4 = vld [vmem:[#allocation6 + $0x8] sm:$0xff] (!%p747_p10) }
 0x108   : > { %vm415_vm0 = vcmp.lt.s32.totalorder %v1177_v32, %v407_v8  ;;  %v463_v19 = vsel %vm441_vm3, %v436_v14, 0.0  ;;  %v439_v20 = vunpack.c.l.bf16 %v430_v15  ;;  %v460_v25 = vadd.f32 %v459_v9, %v458_v58 }
 0x109   : > { %v453_v17 = vadd.f32 %v452_v10, %v451_v2  ;;  %vm423_vm1 = vmpackc.low %vm415_vm0, %vm415_vm0  ;;  %v472_v18 = vadd.f32 %v471_v13, %v470_v6  ;;  %v480_v23 = vrot.slane %v479_v11, 2  ;;  %v464_v24 = vrot.slane %v463_v19, 4  ;;  %v532_v6 = vld [vmem:[#allocation6 + $0x10] sm:$0xff] (!%p747_p10)  ;;  %v533_v10 = vld [vmem:[#allocation6 + $0x18] sm:$0xff] (!%p747_p10) }
 0x10a   : > { %v431_v21 = vsel %vm423_vm1, %v297_v12, 0  ;;  %v484_v27 = vsel %vm441_vm3, %v439_v20, 0.0  ;;  %v447_v29 = vrot.slane %v446_v16, 1  ;;  %v461_v38 = vrot.slane %v460_v25, 1 }
 0x10b   : > { %v454_v22 = vrot.slane %v453_v17, 1  ;;  %v473_v26 = vrot.slane %v472_v18, 2  ;;  %v440_v28 = vunpack.c.l.bf16 %v431_v21  ;;  %v465_v30 = vadd.f32 %v464_v24, %v463_v19 }
 0x10c   : > { %v485_v31 = vrot.slane %v484_v27, 4  ;;  %v481_v35 = vadd.f32 %v480_v23, %v479_v11  ;;  %v448_v40 = vadd.f32 %v447_v29, %v446_v16  ;;  %v462_v49 = vadd.f32 %v461_v38, %v460_v25 }
 0x10d   : > { %v474_v32 = vadd.f32 %v473_v26, %v472_v18  ;;  %v491_v33 = vsel %vm441_vm3, %v440_v28, 0.0  ;;  %v455_v34 = vadd.f32 %v454_v22, %v453_v17  ;;  %v466_v36 = vrot.slane %v465_v30, 2  ;;  %v749_v18 = vld [vmem:[%s1247_s3] ss:$0 sm:$0xff] (!%p747_p10) }
 0x10e   : > { %v486_v37 = vadd.f32 %v485_v31, %v484_v27  ;;  %v492_v39 = vrot.slane %v491_v33, 4  ;;  %v482_v46 = vrot.slane %v481_v35, 1  ;;  %v527_v7 = vcvt.s32.f32 (!%p747_p10), %v1171_v5 }
 0x10f   : > { %v467_v41 = vadd.f32 %v466_v36, %v465_v30  ;;  %v475_v43 = vrot.slane %v474_v32, 1  ;;  %v507_v45 = vsel %vm506_vm2, %v455_v34, %v448_v40  ;;  %v1006_v8 = vmov (!%p747_p10), 0.0|0.0  }
 0x110   : > { %v487_v42 = vrot.slane %v486_v37, 2  ;;  %v493_v44 = vadd.f32 %v492_v39, %v491_v33  ;;  %v509_v54 = vsel %vm508_vm4, %v462_v49, %v507_v45  ;;  %v483_v56 = vadd.f32 %v482_v46, %v481_v35  ;;  %770 = vmatprep.subr.bf16.mxu0 (!%p747_p10), %v1006_v8 }
 0x111   : > { %v468_v47 = vrot.slane %v467_v41, 1  ;;  %v476_v53 = vadd.f32 %v475_v43, %v474_v32  ;;  %v771_v9 = vpack.c.bf16 (!%p747_p10), %v531_v4, %v530_v3  ;;  %v1008_v11 = vmov (!%p747_p10), 0.0  }
 0x112   : > { %v488_v48 = vadd.f32 %v487_v42, %v486_v37  ;;  %v494_v50 = vrot.slane %v493_v44, 2  ;;  %767 = vmatprep.mubr.msk.f32.mxu0 (!%p747_p10), %vm1007_vm10, %v1008_v11  ;;  %v1009_v12 = vmov (!%p747_p10), 0   ;;  %v528_v13 = vmax.f32 (!%p747_p10), %v527_v7, 1.0 }
 0x113   : > { %v469_v51 = vadd.f32 %v468_v47, %v467_v41  ;;  %857 = vset.pattern.permute.xlu0 (!%p747_p10), %v1009_v12  ;;  %772 = vmatpush3.bf16.msra.mxu0 (!%p747_p10), %v771_v9  ;;  %v774_v14 = vpack.c.bf16 (!%p747_p10), %v533_v10, %v532_v6 }
 0x114   : > { %v489_v52 = vrot.slane %v488_v48, 1  ;;  %v495_v55 = vadd.f32 %v494_v50, %v493_v44  ;;  %773 = vmatprep.subr.bf16.mxu0 (!%p747_p10), %v1006_v8  ;;  %858 = vrcp.f32 (!%p747_p10), %v528_v13 }
 0x115   : > { %v511_v57 = vsel %vm510_vm5, %v469_v51, %v509_v54 }
 0x116   : > { %v490_v58 = vadd.f32 %v489_v52, %v488_v48  ;;  %v513_v59 = vsel %vm512_vm6, %v476_v53, %v511_v57  ;;  %v496_v60 = vrot.slane %v495_v55, 1 }
 0x117   : > { %v515_v61 = vsel %vm514_vm7, %v483_v56, %v513_v59  ;;  %526 = sbr.rel (%p747_p10) target bundleno = 670 (0x29e), region = 52  ;;  %775 = vmatpush3.bf16.msra.mxu0 (!%p747_p10), %v774_v14 }
 0x118   : > { %v517_v62 = vsel %vm516_vm8, %v490_v58, %v515_v61  ;;  %v497_v0 = vadd.f32 %v496_v60, %v495_v55 }
 0x11a   : > { %v519_v1 = vsel %vm518_vm9, %v497_v0, %v517_v62 }
 0x11b   : > { %v521_v2 = vadd.f32 %v519_v1, %v432_v63 }
 0x11d   : > { %522 = vst.msk [vmem:[#allocation2] sm:$0xff] %vm441_vm3, %v521_v2 }
 0x11e   : > { %v859_v16 = vpop.eup %858 }
 0x11f   : > { %611 = vperm.xlu0 %857, %v859_v16  }
 0x124   : > { %v529_v15 = vld [vmem:[#allocation2] sm:$0xff] }
 0x125   : > { %768 = vmatmul.mubr.msk.f32.vlgmr.msra.gmra.mrb[0].mxu0 %vm441_vm3, %v529_v15 }
 0x19e   : > { %v612_v5 = vpop.permute.xlu0 %611 }
 0x1f8   : > { %v603_v17 = vpop.f32.mrb[0].mxu0 }
 0x1f9   : > { %v614_v19 = vmul.f32 %v612_v5, %v603_v17  ;;  %v769_v20 = vpop.f32.mrb[1].mxu0 }
 0x1fb   : > { %v622_v21 = vadd.f32 %v749_v18, %v614_v19 }
 0x1fd   : > { %v623_v22 = vmul.f32 %v622_v21, %v622_v21 }
 0x1ff   : > { %v624_v23 = vsel %vm441_vm3, %v623_v22, 0.0 }
 0x200   : > { %625 = vadd.xlane.f32.xlu0 %v624_v23 }
 0x28d   : > { %v626_v24 = vpop.xlane.xlu0 %625 }
 0x28e   : > { %v627_v25 = vmax.f32 %v626_v24, 1e-24 }
 0x290   : > { %860 = vrsqrt.f32 %v627_v25 }
 0x29a   : > { %v861_v26 = vpop.eup %860 }
 0x29b   : > { %v629_v27 = vmul.f32 %v861_v26, %v622_v21 }
 0x29d   : > { %630 = vst.msk [vmem:[#allocation8] sm:$0xff] %vm441_vm3, %v629_v27 }
 0x29e PF: > { %p750_p12 = scmp.ne.s32.totalorder %s1067_s21, 1 }
 0x2a0   : > { %633 = sbr.rel (%p750_p12) target bundleno = 698 (0x2ba), region = 56 }
 0x2a7   : > { %639 = vsyncadd [#allocation5], 96  ;;  %s1010_s30 = smov [#allocation8]  }
 0x2a8   : > { %s644_s15 = sshll.u32 %s1010_s30, 4  ;;  %s645_s15 = int_to_ptr.vmem [resolvable:$true] %s644_s15 }
 0x2a9   : > { %s914_s23 = scalar_lea.vmem %s645_s15, 32  ;;  %s918_s25 = scalar_lea.vmem %s645_s15, 128 }
 0x2aa   : > { %p915_p0 = scmp.ne.s32.totalorder %s645_s15, %s914_s23  ;;  %p919_p2 = scmp.lt.s32.totalorder %s645_s15, %s645_s15 }
 0x2ab   : > { %p920_p4 = scmp.lt.s32.totalorder %s918_s25, %s914_s23 }
 0x2ad   : > { %p921_p6 = por %p920_p4, %p919_p2 }
 0x2af   : > { %p922_p7 = pnand %p921_p6, %p915_p0 }
 0x2b1   : > { %925 = shalt.err (!%p922_p7)
}
 0x2b2   : > { %s926_s8 = scalar_lea.hbm %s1248_s4, 32 }
 0x2b3   : > { %p927_p9 = scmp.ne.s32.totalorder %s1248_s4, %s926_s8  ;;  %p930_p11 = scmp.lt.u32.totalorder %s926_s8, %s1248_s4 }
 0x2b5   : > { %p932_p13 = pnand %p930_p11, %p927_p9 }
 0x2b7   : > { %935 = shalt.err (!%p932_p13)
}
 0x2b8   : > { %s1011_s12 = smov 32   ;;  %s1012_s13 = smov 2  }
 0x2b9   : > { %650 = dma.vmem_to_hbm [thread:$0]  %s645_s15, 32, %s1248_s4, [#allocation5], %s1011_s12, %s1011_s12, %s1012_s13  }
 0x2ba PF: > { %p789_p1 = scmp.eq.s32.totalorder %s1067_s21, 1 }
 0x2bc   : > { %969 = dma.done.wait (%p789_p1), [#allocation5], 128  }
 0x2bd   : > { %971 = vsyncadd (%p789_p1), [#allocation5], 4294967168 }
 0x2be PF: > { %s19_s20 = sadd.s32 1, %s994_s20   ;;  %s1261_s15 = smov %s978_s16 }
 0x2bf   : > { %p16_p3 = scmp.ge.s32.totalorder %s19_s20, 4   ;;  %s1262_s16 = smov %s982_s17 }
 0x2c0   : > { %s1263_s17 = smov %s1093_s27  ;;  %s1264_s18 = smov %s990_s19 }
 0x2c1   : > { %s1265_s19 = smov %s1267_s22  ;;  %18 = sbr.rel (!%p16_p3) target bundleno = 6 (0x6), region = 89 }
 0x2c8   :  { %660 = vsyncpa [#allocation4], 1 }
 0x2c9   :  { %662 = vsyncpa [#allocation4 + $0x1], 1 }
 0x2ca   :  { %663 = vsyncpa [#allocation7], 1 }
 0x2cb   :  { %664 = vsyncpa [#allocation5], 1 }
 0x2cc   :  { %666 = vsyncpa [#allocation5 + $0x1], 1 }

</bundles_post_ra>
